<compile_context>
chip_gen: v6e
topology: v6e:2x2x1
jax: 0.10.0
libtpu: 0.0.40
codegen_flags: <defaults>
</compile_context>

<pallas_src>
import jax
import jax.numpy as jnp
from jax.experimental import pallas as pl
from jax.experimental.pallas import tpu as pltpu

IN_DIM = 20
HID_DIM = 40
OUT_DIM = 1

PACK = 128                    # logical rows packed into one lane-dense row
PACKED_W = PACK * IN_DIM      # 2560 = 128 * 20, multiple of 128 lanes
DEFAULT_TP = 256              # packed rows per grid step = 32768 logical rows
                              # (~2.5 MiB input / ~128 KiB output per step)


def confidence_net_kernel(x_ref, w_ref, b_ref, o_ref):
    # x_ref: (tp, 2560)  packed input tile (streamed)
    # w_ref: (2560, 128) block-diagonal folded weight (resident)
    # b_ref: (1, 128)    folded bias, broadcast over rows (resident)
    # o_ref: (tp, 128)   lane-dense output tile
    x = x_ref[...].astype(jnp.float32)
    # Block-diagonal matmul on the MXU: y[p, j] = sum_k x[p, j*20+k] * w_eff[k]
    # (MXU is idle filler here -- the kernel is HBM-bound -- and it produces
    # the lane-dense (tp, 128) output tile for free.)
    y = jnp.dot(x, w_ref[...], preferred_element_type=jnp.float32)
    o_ref[...] = (y + b_ref[...]).astype(o_ref.dtype)


def confidence_net_forward(x, w1, b1, w2, b2, *, tp=DEFAULT_TP):
    """x: (B, 20); w1: (40, 20); b1: (40,); w2: (1, 40); b2: (1,). -> (B, 1)"""
    B = x.shape[0]
    out_dtype = x.dtype

    # ---- Fold the two linear layers once (outside the kernel) --------------
    w1t = w1.astype(jnp.float32).T                                  # (20, 40)
    w2t = w2.astype(jnp.float32).T                                  # (40, 1)
    w_eff = w1t @ w2t                                               # (20, 1)
    b_eff = b1.astype(jnp.float32) @ w2t + b2.astype(jnp.float32)   # (1,)

    # Block-diagonal weight for the packed layout: (2560, 128), ~1.25 MiB.
    # kron(I_128, w_eff)[j*20 + k, j] = w_eff[k]
    w_bd = jnp.kron(jnp.eye(PACK, dtype=jnp.float32), w_eff)        # (2560, 128)
    b_tile = jnp.broadcast_to(b_eff.reshape(1, 1), (1, PACK)).astype(jnp.float32)

    # ---- Pack 128 logical rows per lane-dense row ---------------------------
    # Free contiguous reshape when B % 128 == 0; otherwise pad at most 127
    # rows (small; the old worst-case pad of tb-1 rows is gone).
    P = pl.cdiv(B, PACK)
    Bp = P * PACK
    if Bp != B:
        x = jnp.pad(x, ((0, Bp - B), (0, 0)))
    x_packed = x.reshape(P, PACKED_W)

    # ---- Grid over packed rows; ragged final block instead of padding ------
    tp = min(tp, P)                         # tp == P (full dim) or 256 (mult of 8)
    num_blocks = pl.cdiv(P, tp)
    P_out = num_blocks * tp                 # output padded to whole blocks

    bytes_accessed = (Bp * IN_DIM * 4          # packed input read
                      + P_out * PACK * 4       # lane-dense output write
                      + PACKED_W * PACK * 4    # resident block-diag weight
                      + PACK * 4)              # resident bias
    flops = 2 * P_out * PACKED_W * PACK        # MXU work actually issued

    out = pl.pallas_call(
        confidence_net_kernel,
        out_shape=jax.ShapeDtypeStruct((P_out, PACK), out_dtype),
        grid=(num_blocks,),
        in_specs=[
            # Packed input streams tile-by-tile down the (packed) batch axis.
            pl.BlockSpec((tp, PACKED_W), lambda i: (i, 0)),
            # Folded block-diagonal weight + bias stay resident (constant map).
            pl.BlockSpec((PACKED_W, PACK), lambda i: (0, 0)),
            pl.BlockSpec((1, PACK), lambda i: (0, 0)),
        ],
        out_specs=pl.BlockSpec((tp, PACK), lambda i: (i, 0)),
        compiler_params=pltpu.CompilerParams(
            dimension_semantics=("parallel",),       # v7x: shard steps over 2 TCs
            vmem_limit_bytes=32 * 1024 * 1024,       # ~8 MiB used; ample headroom
        ),
        cost_estimate=pl.CostEstimate(
            flops=flops, transcendentals=0, bytes_accessed=bytes_accessed),
    )(x_packed, w_bd, b_tile)

    # Packed (P_out, 128) -> (B, 1): contiguous reshape + slice off pad rows.
    return out.reshape(P_out * PACK, OUT_DIM)[:B]


if __name__ == "__main__":
    key = jax.random.PRNGKey(0)
    kw1, kw2, kb1, kb2, kx1, kx2, kx3, kx4 = jax.random.split(key, 8)

    # Parameters mirroring ConfidenceLinearLayer.init_parameters (weights ~
    # randn).  Biases are zero at init in the module; we use small random
    # biases here so the bias path of forward() is actually exercised.
    w1 = jax.random.normal(kw1, (HID_DIM, IN_DIM), dtype=jnp.float32)
    b1 = 0.1 * jax.random.normal(kb1, (HID_DIM,), dtype=jnp.float32)
    w2 = jax.random.normal(kw2, (OUT_DIM, HID_DIM), dtype=jnp.float32)
    b2 = 0.1 * jax.random.normal(kb2, (OUT_DIM,), dtype=jnp.float32)

    def ref_fwd(xx):
        return (xx @ w1.T + b1) @ w2.T + b2

    # (batch, tile override): covers single-block, free-reshape (B % 128 == 0),
    # pad-to-128 path, and multi-block grid with a ragged final block.
    cases = [
        (8, None, kx1),       # tiny batch, P=1, single block
        (2048, None, kx2),    # multiple of 128: zero-copy packing path
        (1029, None, kx3),    # pad-to-128 path, single block
        (4100, 8, kx4),       # multi-block grid (5 steps) with ragged last block
    ]
    for batch, tp_override, kx in cases:
        x = jax.random.normal(kx, (batch, IN_DIM), dtype=jnp.float32)
        kwargs = {} if tp_override is None else {"tp": tp_override}
        out = jax.block_until_ready(
            confidence_net_forward(x, w1, b1, w2, b2, **kwargs))
        assert out.shape == (batch, OUT_DIM)
        ref = ref_fwd(x)
        # Tolerance accounts for layer folding + MXU pass/accumulation-order
        # differences vs. the two-step f32 reference (outputs are O(10-100)).
        assert jnp.allclose(out, ref, atol=5e-2, rtol=5e-3), (
            batch, float(jnp.max(jnp.abs(out - ref))))

    print("KERNEL_OK")
</pallas_src>

<mosaic_0001>
module attributes {stable_mosaic.version = 11 : i64} {
  func.func @confidence_net_kernel(%arg0: i32, %arg1: memref<1x2560xf32, #tpu.memory_space<vmem>>, %arg2: memref<2560x128xf32, #tpu.memory_space<vmem>>, %arg3: memref<1x128xf32, #tpu.memory_space<vmem>>, %arg4: memref<1x128xf32, #tpu.memory_space<vmem>>) attributes {dimension_semantics = [#tpu.dimension_semantics<parallel>], iteration_bounds = array<i64: 1>, scalar_prefetch = 0 : i64, scratch_operands = 0 : i64, tpu.core_type = #tpu.core_type<tc>, window_params = [{transform_indices = @transform_0, window_bounds = array<i64: 1, 2560>}, {pipeline_mode = #tpu.pipeline_mode<synchronous>, transform_indices = @transform_1, window_bounds = array<i64: 2560, 128>}, {pipeline_mode = #tpu.pipeline_mode<synchronous>, transform_indices = @transform_2, window_bounds = array<i64: 1, 128>}, {transform_indices = @transform_3, window_bounds = array<i64: 1, 128>}]} {
    %c0 = arith.constant 0 : index
    %c0_0 = arith.constant 0 : index
    %0 = vector.load %arg1[%c0, %c0_0] : memref<1x2560xf32, #tpu.memory_space<vmem>>, vector<1x2560xf32>
    %c0_1 = arith.constant 0 : index
    %c0_2 = arith.constant 0 : index
    %1 = vector.load %arg2[%c0_1, %c0_2] : memref<2560x128xf32, #tpu.memory_space<vmem>>, vector<2560x128xf32>
    %cst = arith.constant dense<0.000000e+00> : vector<1x128xf32>
    %2 = tpu.matmul %0, %1, %cst {dimension_numbers = #tpu.dot_dimension_numbers<[1], [0], [0], [1], [0, 0, 1, 1], [], []>} : vector<1x2560xf32>, vector<2560x128xf32>, vector<1x128xf32> -> vector<1x128xf32>
    %c0_3 = arith.constant 0 : index
    %c0_4 = arith.constant 0 : index
    %3 = vector.load %arg3[%c0_3, %c0_4] : memref<1x128xf32, #tpu.memory_space<vmem>>, vector<1x128xf32>
    %4 = arith.addf %2, %3 : vector<1x128xf32>
    %c0_5 = arith.constant 0 : index
    %c0_6 = arith.constant 0 : index
    %5 = vector.load %arg4[%c0_5, %c0_6] : memref<1x128xf32, #tpu.memory_space<vmem>>, vector<1x128xf32>
    tpu.vector_store %arg4[%c0_5, %c0_6], %4 {strides = array<i32>} : memref<1x128xf32, #tpu.memory_space<vmem>>, vector<1x128xf32>,
    return
  }
  func.func @transform_0(%arg0: i32) -> (i32, i32) {
    %c0_i32 = arith.constant 0 : i32
    %c0_i32_0 = arith.constant 0 : i32
    return %arg0, %c0_i32 : i32, i32
  }
  func.func @transform_1(%arg0: i32) -> (i32, i32) {
    %c0_i32 = arith.constant 0 : i32
    %c0_i32_0 = arith.constant 0 : i32
    %c0_i32_1 = arith.constant 0 : i32
    return %c0_i32, %c0_i32_0 : i32, i32
  }
  func.func @transform_2(%arg0: i32) -> (i32, i32) {
    %c0_i32 = arith.constant 0 : i32
    %c0_i32_0 = arith.constant 0 : i32
    %c0_i32_1 = arith.constant 0 : i32
    return %c0_i32, %c0_i32_0 : i32, i32
  }
  func.func @transform_3(%arg0: i32) -> (i32, i32) {
    %c0_i32 = arith.constant 0 : i32
    %c0_i32_0 = arith.constant 0 : i32
    return %arg0, %c0_i32 : i32, i32
  }
}

</mosaic_0001>

<bundles_post_ra>
// kernel: tpu_custom_call.1
= control target key start
LH: loop header
LB: loop body
LE: loop exit
PB: predicated region body
PF: predicated region fallthrough
CT: control target
= control target key end

     0   :  { %8 = vsyncpa [#allocation3], 0  ;;  %s1742_s0 = inlined_call_operand.hbm [shape: f32[1,2560], index: 0, kind: input, shape index: {}]   ;;  %s1743_s1 = inlined_call_operand.hbm [shape: f32[2560,128], index: 1, kind: input, shape index: {}]   ;;  %s1744_s2 = inlined_call_operand.hbm [shape: f32[1,128], index: 2, kind: input, shape index: {}]   ;;  %s1745_s3 = inlined_call_operand.hbm [shape: f32[1,128], index: 3, kind: output, shape index: {}]  }
   0x1   :  { %9 = vsyncpa [#allocation6], 0 }
   0x2   :  { %10 = vsyncpa [#allocation4], 0  ;;  %s1638_s12 = smov [#allocation5]  }
   0x3   :  { %s26_s13 = sshll.u32 %s1638_s12, 4  ;;  %s27_s13 = int_to_ptr.vmem [resolvable:$true] %s26_s13 }
   0x4   :  { %s1560_s14 = scalar_lea.vmem %s27_s13, 40960  ;;  %p1565_p1 = scmp.lt.s32.totalorder %s27_s13, %s27_s13 }
   0x5   :  { %p1561_p0 = scmp.ne.s32.totalorder %s27_s13, %s1560_s14  ;;  %p1566_p2 = scmp.lt.s32.totalorder %s1560_s14, %s1560_s14 }
   0x7   :  { %p1567_p3 = por %p1566_p2, %p1565_p1 }
   0x9   :  { %p1568_p4 = pnand %p1567_p3, %p1561_p0 }
   0xb   :  { %1571 = shalt.err (!%p1568_p4)
}
   0xc   :  { %s1639_s15 = smov 128   ;;  %s1640_s16 = smov 8  }
   0xd   :  { %32 = dma.hbm_to_vmem [thread:$0]  %s1743_s1, 40960, %s27_s13, [#allocation6], %s1639_s15, %s1639_s15, %s1640_s16  }
   0xe   :  { %s1641_s19 = smov [#allocation2]   ;;  %s1642_s21 = smov [#allocation7]  }
   0xf   :  { %s17_s20 = sshll.u32 %s1641_s19, 4  ;;  %s39_s22 = sshll.u32 %s1642_s21, 4  ;;  %s18_s20 = int_to_ptr.vmem [resolvable:$true] %s17_s20  ;;  %s40_s22 = int_to_ptr.vmem [resolvable:$true] %s39_s22 }
  0x10   :  { %s1580_s23 = scalar_lea.vmem %s18_s20, 320  ;;  %p1585_p6 = scmp.lt.s32.totalorder %s18_s20, %s18_s20 }
  0x11   :  { %p1581_p5 = scmp.ne.s32.totalorder %s18_s20, %s1580_s23  ;;  %p1586_p7 = scmp.lt.s32.totalorder %s1580_s23, %s1580_s23 }
  0x13   :  { %p1587_p8 = por %p1586_p7, %p1585_p6 }
  0x15   :  { %p1588_p9 = pnand %p1587_p8, %p1581_p5 }
  0x17   :  { %1591 = shalt.err (!%p1588_p9)
}
  0x18   :  { %20 = dma.hbm_to_vmem [thread:$0]  %s1742_s0, 320, %s18_s20, [#allocation3]  }
  0x19   :  { %s1600_s26 = scalar_lea.vmem %s40_s22, 16  ;;  %s1604_s1 = scalar_lea.vmem %s40_s22, 32 }
  0x1a   :  { %p1601_p10 = scmp.ne.s32.totalorder %s40_s22, %s1600_s26  ;;  %p1605_p11 = scmp.lt.s32.totalorder %s40_s22, %s40_s22 }
  0x1b   :  { %p1606_p12 = scmp.lt.s32.totalorder %s1604_s1, %s1600_s26 }
  0x1d   :  { %p1607_p13 = por %p1606_p12, %p1605_p11 }
  0x1f   :  { %p1608_p0 = pnand %p1607_p13, %p1601_p10 }
  0x21   :  { %1611 = shalt.err (!%p1608_p0)
}
  0x22   :  { %42 = dma.hbm_to_vmem [thread:$0]  %s1744_s2, 16, %s40_s22, [#allocation6]  }
  0x23   :  { %1632 = dma.done.wait [#allocation3], 320  }
  0x24   :  { %1633 = vsyncadd [#allocation3], 4294966976 }
  0x25   :  { %1634 = dma.done.wait [#allocation6], 40976  }
  0x26   :  { %1635 = vsyncadd [#allocation6], 4294926320  ;;  %v86_v0 = vld [vmem:[#allocation5 + $0xf8] sm:$0xff]  ;;  %v85_v4 = vld [vmem:[#allocation5 + $0xf0] sm:$0xff]  ;;  %v379_v38 = vlaneseq  ;;  %s1643_s0 = smov [#allocation8]  }
  0x27   :  { %v118_v1 = vld [vmem:[#allocation5 + $0x1f8] sm:$0xff]  ;;  %1196 = vmatprep.subr.mxu0 %v86_v0  ;;  %v117_v5 = vld [vmem:[#allocation5 + $0x1f0] sm:$0xff]  ;;  %v84_v8 = vld [vmem:[#allocation5 + $0xe8] sm:$0xff]  ;;  %s1186_s2 = sshll.u32 %s1643_s0, 4  ;;  %s1187_s2 = int_to_ptr.vmem [resolvable:$true] %s1186_s2 }
  0x28   :  { %v70_v2 = vld [vmem:[#allocation5 + $0x78] sm:$0xff]  ;;  %1231 = vmatprep.subr.mxu1 %v118_v1  ;;  %v69_v6 = vld [vmem:[#allocation5 + $0x70] sm:$0xff]  ;;  %v116_v9 = vld [vmem:[#allocation5 + $0x1e8] sm:$0xff]  ;;  %v1673_v47 = vshrl.u32 %v379_v38, 7  ;;  %s1612_s29 = scalar_lea.vmem %s1187_s2, 16  ;;  %s1616_s30 = scalar_lea.vmem %s1187_s2, 32 }
  0x29   :  { %v102_v3 = vld [vmem:[#allocation5 + $0x178] sm:$0xff]  ;;  %1197 = vmatpush3.msra.mxu0 %v70_v2  ;;  %v101_v7 = vld [vmem:[#allocation5 + $0x170] sm:$0xff]  ;;  %v68_v10 = vld [vmem:[#allocation5 + $0x68] sm:$0xff]  ;;  %p1613_p1 = scmp.ne.s32.totalorder %s1187_s2, %s1612_s29  ;;  %p1617_p2 = scmp.lt.s32.totalorder %s1187_s2, %s1187_s2 }
  0x2a   :  { %1232 = vmatpush3.msra.mxu1 %v102_v3  ;;  %1198 = vmatprep.subr.mxu0 %v85_v4  ;;  %v100_v11 = vld [vmem:[#allocation5 + $0x168] sm:$0xff]  ;;  %v83_v12 = vld [vmem:[#allocation5 + $0xe0] sm:$0xff]  ;;  %v82_v16 = vld [vmem:[#allocation5 + $0xd8] sm:$0xff]  ;;  %v1676_v56 = vsub.s32 1, %v1673_v47  ;;  %v1681_v60 = vsub.s32 0, %v1673_v47  ;;  %v1684_v63 = vsub.s32 3, %v1673_v47  ;;  %p1618_p3 = scmp.lt.s32.totalorder %s1616_s30, %s1612_s29 }
  0x2b   :  { %1233 = vmatprep.subr.mxu1 %v117_v5  ;;  %1199 = vmatpush3.msra.mxu0 %v69_v6  ;;  %v115_v13 = vld [vmem:[#allocation5 + $0x1e0] sm:$0xff]  ;;  %v114_v17 = vld [vmem:[#allocation5 + $0x1d8] sm:$0xff]  ;;  %v81_v20 = vld [vmem:[#allocation5 + $0xd0] sm:$0xff]  ;;  %v1687_v2 = vsub.s32 2, %v1673_v47 }
  0x2c   :  { %1234 = vmatpush3.msra.mxu1 %v101_v7  ;;  %1200 = vmatprep.subr.mxu0 %v84_v8  ;;  %v67_v14 = vld [vmem:[#allocation5 + $0x60] sm:$0xff]  ;;  %v66_v18 = vld [vmem:[#allocation5 + $0x58] sm:$0xff]  ;;  %v113_v21 = vld [vmem:[#allocation5 + $0x1d0] sm:$0xff]  ;;  %p1619_p4 = por %p1618_p3, %p1617_p2 }
  0x2d   :  { %1235 = vmatprep.subr.mxu1 %v116_v9  ;;  %v99_v15 = vld [vmem:[#allocation5 + $0x160] sm:$0xff]  ;;  %1201 = vmatpush3.msra.mxu0 %v68_v10  ;;  %v98_v19 = vld [vmem:[#allocation5 + $0x158] sm:$0xff]  ;;  %v65_v22 = vld [vmem:[#allocation5 + $0x50] sm:$0xff] }
  0x2e   :  { %1236 = vmatpush3.msra.mxu1 %v100_v11  ;;  %1202 = vmatprep.subr.mxu0 %v83_v12  ;;  %v97_v23 = vld [vmem:[#allocation5 + $0x150] sm:$0xff]  ;;  %v80_v24 = vld [vmem:[#allocation5 + $0xc8] sm:$0xff]  ;;  %v79_v28 = vld [vmem:[#allocation5 + $0xc0] sm:$0xff]  ;;  %p1620_p5 = pnand %p1619_p4, %p1613_p1 }
  0x2f   :  { %1237 = vmatprep.subr.mxu1 %v115_v13  ;;  %1203 = vmatpush3.msra.mxu0 %v67_v14  ;;  %v112_v25 = vld [vmem:[#allocation5 + $0x1c8] sm:$0xff]  ;;  %v111_v29 = vld [vmem:[#allocation5 + $0x1c0] sm:$0xff]  ;;  %v78_v32 = vld [vmem:[#allocation5 + $0xb8] sm:$0xff] }
  0x30   :  { %1238 = vmatpush3.msra.mxu1 %v99_v15  ;;  %1204 = vmatprep.subr.mxu0 %v82_v16  ;;  %v64_v26 = vld [vmem:[#allocation5 + $0x48] sm:$0xff]  ;;  %v63_v30 = vld [vmem:[#allocation5 + $0x40] sm:$0xff]  ;;  %v110_v33 = vld [vmem:[#allocation5 + $0x1b8] sm:$0xff] }
  0x31   :  { %1239 = vmatprep.subr.mxu1 %v114_v17  ;;  %1205 = vmatpush3.msra.mxu0 %v66_v18  ;;  %v96_v27 = vld [vmem:[#allocation5 + $0x148] sm:$0xff]  ;;  %v95_v31 = vld [vmem:[#allocation5 + $0x140] sm:$0xff]  ;;  %v62_v34 = vld [vmem:[#allocation5 + $0x38] sm:$0xff] }
  0x32   :  { %1240 = vmatpush3.msra.mxu1 %v98_v19  ;;  %1206 = vmatprep.subr.mxu0 %v81_v20  ;;  %v94_v35 = vld [vmem:[#allocation5 + $0x138] sm:$0xff]  ;;  %v77_v36 = vld [vmem:[#allocation5 + $0xb0] sm:$0xff]  ;;  %v76_v41 = vld [vmem:[#allocation5 + $0xa8] sm:$0xff] }
  0x33   :  { %1241 = vmatprep.subr.mxu1 %v113_v21  ;;  %1207 = vmatpush3.msra.mxu0 %v65_v22  ;;  %v109_v37 = vld [vmem:[#allocation5 + $0x1b0] sm:$0xff]  ;;  %v108_v42 = vld [vmem:[#allocation5 + $0x1a8] sm:$0xff]  ;;  %v75_v45 = vld [vmem:[#allocation5 + $0xa0] sm:$0xff] }
  0x34   :  { %1242 = vmatpush3.msra.mxu1 %v97_v23  ;;  %1208 = vmatprep.subr.mxu0 %v80_v24  ;;  %v61_v39 = vld [vmem:[#allocation5 + $0x30] sm:$0xff]  ;;  %v60_v43 = vld [vmem:[#allocation5 + $0x28] sm:$0xff]  ;;  %v107_v46 = vld [vmem:[#allocation5 + $0x1a0] sm:$0xff] }
  0x35   :  { %1243 = vmatprep.subr.mxu1 %v112_v25  ;;  %1209 = vmatpush3.msra.mxu0 %v64_v26  ;;  %v93_v40 = vld [vmem:[#allocation5 + $0x130] sm:$0xff]  ;;  %v92_v44 = vld [vmem:[#allocation5 + $0x128] sm:$0xff]  ;;  %v59_v48 = vld [vmem:[#allocation5 + $0x20] sm:$0xff] }
  0x36   :  { %1244 = vmatpush3.msra.mxu1 %v96_v27  ;;  %1210 = vmatprep.subr.mxu0 %v79_v28  ;;  %v91_v49 = vld [vmem:[#allocation5 + $0x120] sm:$0xff]  ;;  %v74_v50 = vld [vmem:[#allocation5 + $0x98] sm:$0xff]  ;;  %v73_v54 = vld [vmem:[#allocation5 + $0x90] sm:$0xff] }
  0x37   :  { %1245 = vmatprep.subr.mxu1 %v111_v29  ;;  %1211 = vmatpush3.msra.mxu0 %v63_v30  ;;  %v106_v51 = vld [vmem:[#allocation5 + $0x198] sm:$0xff]  ;;  %v105_v55 = vld [vmem:[#allocation5 + $0x190] sm:$0xff]  ;;  %v72_v61 = vld [vmem:[#allocation5 + $0x88] sm:$0xff] }
  0x38   :  { %1246 = vmatpush3.msra.mxu1 %v95_v31  ;;  %1212 = vmatprep.subr.mxu0 %v78_v32  ;;  %v58_v52 = vld [vmem:[#allocation5 + $0x18] sm:$0xff]  ;;  %v57_v57 = vld [vmem:[#allocation5 + $0x10] sm:$0xff]  ;;  %v104_v62 = vld [vmem:[#allocation5 + $0x188] sm:$0xff] }
  0x39   :  { %1247 = vmatprep.subr.mxu1 %v110_v33  ;;  %1213 = vmatpush3.msra.mxu0 %v62_v34  ;;  %v90_v53 = vld [vmem:[#allocation5 + $0x118] sm:$0xff]  ;;  %v89_v58 = vld [vmem:[#allocation5 + $0x110] sm:$0xff]  ;;  %v56_v0 = vld [vmem:[#allocation5 + $0x8] sm:$0xff] }
  0x3a   :  { %1248 = vmatpush3.msra.mxu1 %v94_v35  ;;  %1214 = vmatprep.subr.mxu0 %v77_v36  ;;  %v1678_v59 = vld [vmem:[#allocation2] sm:$0xff]  ;;  %v71_v3 = vld [vmem:[#allocation5 + $0x80] sm:$0xff]  ;;  %v150_v10 = vld [vmem:[#allocation5 + $0x2f8] sm:$0xff] }
  0x3b   :  { %1249 = vmatprep.subr.mxu1 %v109_v37  ;;  %1215 = vmatpush3.msra.mxu0 %v61_v39  ;;  %v88_v1 = vld [vmem:[#allocation5 + $0x108] sm:$0xff]  ;;  %v103_v4 = vld [vmem:[#allocation5 + $0x180] sm:$0xff]  ;;  %v386_v5 = vrot.slane %v1678_v59, %v1676_v56  ;;  %v382_v7 = vrot.slane %v1678_v59, %v1681_v60  ;;  %v394_v9 = vrot.slane %v1678_v59, %v1684_v63  ;;  %v182_v12 = vld [vmem:[#allocation5 + $0x3f8] sm:$0xff] }
  0x3c   :  { %1250 = vmatpush3.msra.mxu1 %v93_v40  ;;  %1216 = vmatprep.subr.mxu0 %v76_v41  ;;  %v55_v6 = vld [vmem:[#allocation5] sm:$0xff]  ;;  %v390_v11 = vrot.slane %v1678_v59, %v1687_v2  ;;  %v134_v13 = vld [vmem:[#allocation5 + $0x278] sm:$0xff]  ;;  %v149_v15 = vld [vmem:[#allocation5 + $0x2f0] sm:$0xff] }
  0x3d   :  { %1251 = vmatprep.subr.mxu1 %v108_v42  ;;  %1217 = vmatpush3.msra.mxu0 %v60_v43  ;;  %v87_v8 = vld [vmem:[#allocation5 + $0x100] sm:$0xff]  ;;  %v166_v14 = vld [vmem:[#allocation5 + $0x378] sm:$0xff]  ;;  %v181_v16 = vld [vmem:[#allocation5 + $0x3f0] sm:$0xff] }
  0x3e   :  { %1252 = vmatpush3.msra.mxu1 %v92_v44  ;;  %1218 = vmatprep.subr.mxu0 %v75_v45  ;;  %v133_v17 = vld [vmem:[#allocation5 + $0x270] sm:$0xff]  ;;  %v148_v19 = vld [vmem:[#allocation5 + $0x2e8] sm:$0xff]  ;;  %v147_v23 = vld [vmem:[#allocation5 + $0x2e0] sm:$0xff] }
  0x3f   :  { %1253 = vmatprep.subr.mxu1 %v107_v46  ;;  %1219 = vmatpush3.msra.mxu0 %v59_v48  ;;  %v165_v18 = vld [vmem:[#allocation5 + $0x370] sm:$0xff]  ;;  %v180_v20 = vld [vmem:[#allocation5 + $0x3e8] sm:$0xff]  ;;  %v179_v24 = vld [vmem:[#allocation5 + $0x3e0] sm:$0xff] }
  0x40   :  { %1254 = vmatpush3.msra.mxu1 %v91_v49  ;;  %1220 = vmatprep.subr.mxu0 %v74_v50  ;;  %v132_v21 = vld [vmem:[#allocation5 + $0x268] sm:$0xff]  ;;  %v131_v25 = vld [vmem:[#allocation5 + $0x260] sm:$0xff]  ;;  %v146_v27 = vld [vmem:[#allocation5 + $0x2d8] sm:$0xff] }
  0x41   :  { %1255 = vmatprep.subr.mxu1 %v106_v51  ;;  %1221 = vmatpush3.msra.mxu0 %v58_v52  ;;  %v164_v22 = vld [vmem:[#allocation5 + $0x368] sm:$0xff]  ;;  %v163_v26 = vld [vmem:[#allocation5 + $0x360] sm:$0xff]  ;;  %v178_v28 = vld [vmem:[#allocation5 + $0x3d8] sm:$0xff] }
  0x42   :  { %1256 = vmatpush3.msra.mxu1 %v90_v53  ;;  %1222 = vmatprep.subr.mxu0 %v73_v54  ;;  %v130_v29 = vld [vmem:[#allocation5 + $0x258] sm:$0xff]  ;;  %v145_v31 = vld [vmem:[#allocation5 + $0x2d0] sm:$0xff]  ;;  %v144_v35 = vld [vmem:[#allocation5 + $0x2c8] sm:$0xff] }
  0x43   :  { %1257 = vmatprep.subr.mxu1 %v105_v55  ;;  %1223 = vmatpush3.msra.mxu0 %v57_v57  ;;  %v162_v30 = vld [vmem:[#allocation5 + $0x358] sm:$0xff]  ;;  %v177_v32 = vld [vmem:[#allocation5 + $0x3d0] sm:$0xff]  ;;  %v176_v36 = vld [vmem:[#allocation5 + $0x3c8] sm:$0xff] }
  0x44   :  { %1258 = vmatpush3.msra.mxu1 %v89_v58  ;;  %1224 = vmatprep.subr.mxu0 %v72_v61  ;;  %v129_v33 = vld [vmem:[#allocation5 + $0x250] sm:$0xff]  ;;  %v128_v37 = vld [vmem:[#allocation5 + $0x248] sm:$0xff]  ;;  %v143_v39 = vld [vmem:[#allocation5 + $0x2c0] sm:$0xff] }
  0x45   :  { %1259 = vmatprep.subr.mxu1 %v104_v62  ;;  %1225 = vmatpush3.msra.mxu0 %v56_v0  ;;  %v161_v34 = vld [vmem:[#allocation5 + $0x350] sm:$0xff]  ;;  %v160_v38 = vld [vmem:[#allocation5 + $0x348] sm:$0xff]  ;;  %v175_v40 = vld [vmem:[#allocation5 + $0x3c0] sm:$0xff] }
  0x46   :  { %1260 = vmatpush3.msra.mxu1 %v88_v1  ;;  %1226 = vmatprep.subr.mxu0 %v71_v3  ;;  %v127_v41 = vld [vmem:[#allocation5 + $0x240] sm:$0xff]  ;;  %v142_v43 = vld [vmem:[#allocation5 + $0x2b8] sm:$0xff]  ;;  %v141_v48 = vld [vmem:[#allocation5 + $0x2b0] sm:$0xff] }
  0x47   :  { %1261 = vmatprep.subr.mxu1 %v103_v4  ;;  %1227 = vmatpush3.msra.mxu0 %v55_v6  ;;  %v159_v42 = vld [vmem:[#allocation5 + $0x340] sm:$0xff]  ;;  %v174_v44 = vld [vmem:[#allocation5 + $0x3b8] sm:$0xff]  ;;  %v173_v49 = vld [vmem:[#allocation5 + $0x3b0] sm:$0xff] }
  0x48   :  { %543 = vmatprep.mubr.f32.mxu0 %v386_v5  ;;  %1262 = vmatpush3.msra.mxu1 %v87_v8  ;;  %v126_v45 = vld [vmem:[#allocation5 + $0x238] sm:$0xff]  ;;  %v125_v50 = vld [vmem:[#allocation5 + $0x230] sm:$0xff]  ;;  %v140_v52 = vld [vmem:[#allocation5 + $0x2a8] sm:$0xff] }
  0x49   :  { %544 = vmatmul.mubr.f32.vlgmr.msra.gmra.mxu0 %v382_v7  ;;  %613 = vmatprep.mubr.f32.mxu1 %v394_v9  ;;  %v158_v46 = vld [vmem:[#allocation5 + $0x338] sm:$0xff]  ;;  %v157_v51 = vld [vmem:[#allocation5 + $0x330] sm:$0xff]  ;;  %v172_v53 = vld [vmem:[#allocation5 + $0x3a8] sm:$0xff]  ;;  %v401_v7 = vsub.s32 5, %v1673_v47 }
  0x4a   :  { %1266 = vmatprep.subr.mxu0 %v150_v10  ;;  %1301 = vmatprep.subr.mxu1 %v182_v12  ;;  %v124_v54 = vld [vmem:[#allocation5 + $0x228] sm:$0xff]  ;;  %v139_v57 = vld [vmem:[#allocation5 + $0x2a0] sm:$0xff]  ;;  %v138_v0 = vld [vmem:[#allocation5 + $0x298] sm:$0xff]  ;;  %v397_v10 = vsub.s32 4, %v1673_v47 }
  0x4b   :  { %614 = vmatmul.mubr.f32.vlgmr.msra.gmra.mxu1 %v390_v11  ;;  %1267 = vmatpush3.msra.mxu0 %v134_v13  ;;  %v156_v55 = vld [vmem:[#allocation5 + $0x328] sm:$0xff]  ;;  %v171_v58 = vld [vmem:[#allocation5 + $0x3a0] sm:$0xff]  ;;  %v170_v1 = vld [vmem:[#allocation5 + $0x398] sm:$0xff]  ;;  %v409_v13 = vsub.s32 7, %v1673_v47 }
  0x4c   :  { %1302 = vmatpush3.msra.mxu1 %v166_v14  ;;  %1268 = vmatprep.subr.mxu0 %v149_v15  ;;  %v123_v61 = vld [vmem:[#allocation5 + $0x220] sm:$0xff]  ;;  %v122_v3 = vld [vmem:[#allocation5 + $0x218] sm:$0xff]  ;;  %v137_v5 = vld [vmem:[#allocation5 + $0x290] sm:$0xff] }
  0x4d   :  { %1303 = vmatprep.subr.mxu1 %v181_v16  ;;  %1269 = vmatpush3.msra.mxu0 %v133_v17  ;;  %v155_v62 = vld [vmem:[#allocation5 + $0x320] sm:$0xff]  ;;  %v154_v4 = vld [vmem:[#allocation5 + $0x318] sm:$0xff]  ;;  %v169_v6 = vld [vmem:[#allocation5 + $0x390] sm:$0xff]  ;;  %v405_v16 = vsub.s32 6, %v1673_v47 }
  0x4e   :  { %1304 = vmatpush3.msra.mxu1 %v165_v18  ;;  %1270 = vmatprep.subr.mxu0 %v148_v19  ;;  %v121_v8 = vld [vmem:[#allocation5 + $0x210] sm:$0xff]  ;;  %v136_v11 = vld [vmem:[#allocation5 + $0x288] sm:$0xff]  ;;  %v135_v17 = vld [vmem:[#allocation5 + $0x280] sm:$0xff]  ;;  %v402_v19 = vrot.slane %v1678_v59, %v401_v7 }
  0x4f   :  { %1305 = vmatprep.subr.mxu1 %v180_v20  ;;  %1271 = vmatpush3.msra.mxu0 %v132_v21  ;;  %v153_v9 = vld [vmem:[#allocation5 + $0x310] sm:$0xff]  ;;  %v168_v12 = vld [vmem:[#allocation5 + $0x388] sm:$0xff]  ;;  %v167_v18 = vld [vmem:[#allocation5 + $0x380] sm:$0xff]  ;;  %v398_v21 = vrot.slane %v1678_v59, %v397_v10 }
  0x50   :  { %1306 = vmatpush3.msra.mxu1 %v164_v22  ;;  %1272 = vmatprep.subr.mxu0 %v147_v23  ;;  %v120_v14 = vld [vmem:[#allocation5 + $0x208] sm:$0xff]  ;;  %v119_v20 = vld [vmem:[#allocation5 + $0x200] sm:$0xff]  ;;  %v410_v23 = vrot.slane %v1678_v59, %v409_v13 }
  0x51   :  { %1307 = vmatprep.subr.mxu1 %v179_v24  ;;  %1273 = vmatpush3.msra.mxu0 %v131_v25  ;;  %v152_v15 = vld [vmem:[#allocation5 + $0x308] sm:$0xff]  ;;  %v151_v22 = vld [vmem:[#allocation5 + $0x300] sm:$0xff]  ;;  %v214_v24 = vld [vmem:[#allocation5 + $0x4f8] sm:$0xff]  ;;  %v406_v25 = vrot.slane %v1678_v59, %v405_v16 }
  0x52   :  { %1308 = vmatpush3.msra.mxu1 %v163_v26  ;;  %1274 = vmatprep.subr.mxu0 %v146_v27  ;;  %v246_v26 = vld [vmem:[#allocation5 + $0x5f8] sm:$0xff]  ;;  %v196_v59 = vld [vmem:[#allocation5 + $0x468] sm:$0xff] }
  0x53   :  { %1309 = vmatprep.subr.mxu1 %v178_v28  ;;  %1275 = vmatpush3.msra.mxu0 %v130_v29  ;;  %v198_v27 = vld [vmem:[#allocation5 + $0x478] sm:$0xff]  ;;  %v213_v29 = vld [vmem:[#allocation5 + $0x4f0] sm:$0xff]  ;;  %v340_v47 = vld [vmem:[#allocation5 + $0x8e8] sm:$0xff] }
  0x54   :  { %1310 = vmatpush3.msra.mxu1 %v162_v30  ;;  %1276 = vmatprep.subr.mxu0 %v145_v31  ;;  %v230_v28 = vld [vmem:[#allocation5 + $0x578] sm:$0xff]  ;;  %v245_v30 = vld [vmem:[#allocation5 + $0x5f0] sm:$0xff] }
  0x55   :  { %1311 = vmatprep.subr.mxu1 %v177_v32  ;;  %1277 = vmatpush3.msra.mxu0 %v129_v33  ;;  %v197_v31 = vld [vmem:[#allocation5 + $0x470] sm:$0xff]  ;;  %v212_v33 = vld [vmem:[#allocation5 + $0x4e8] sm:$0xff] }
  0x56   :  { %1312 = vmatpush3.msra.mxu1 %v161_v34  ;;  %1278 = vmatprep.subr.mxu0 %v144_v35  ;;  %v229_v32 = vld [vmem:[#allocation5 + $0x570] sm:$0xff]  ;;  %v244_v34 = vld [vmem:[#allocation5 + $0x5e8] sm:$0xff] }
  0x57   :  { %1313 = vmatprep.subr.mxu1 %v176_v36  ;;  %1279 = vmatpush3.msra.mxu0 %v128_v37  ;;  %v228_v35 = vld [vmem:[#allocation5 + $0x568] sm:$0xff]  ;;  %v211_v36 = vld [vmem:[#allocation5 + $0x4e0] sm:$0xff] }
  0x58   :  { %1314 = vmatpush3.msra.mxu1 %v160_v38  ;;  %1280 = vmatprep.subr.mxu0 %v143_v39  ;;  %v243_v37 = vld [vmem:[#allocation5 + $0x5e0] sm:$0xff] }
  0x59   :  { %1315 = vmatprep.subr.mxu1 %v175_v40  ;;  %1281 = vmatpush3.msra.mxu0 %v127_v41  ;;  %v195_v38 = vld [vmem:[#allocation5 + $0x460] sm:$0xff]  ;;  %v210_v40 = vld [vmem:[#allocation5 + $0x4d8] sm:$0xff] }
  0x5a   :  { %1316 = vmatpush3.msra.mxu1 %v159_v42  ;;  %1282 = vmatprep.subr.mxu0 %v142_v43  ;;  %v227_v39 = vld [vmem:[#allocation5 + $0x560] sm:$0xff]  ;;  %v242_v41 = vld [vmem:[#allocation5 + $0x5d8] sm:$0xff] }
  0x5b   :  { %1317 = vmatprep.subr.mxu1 %v174_v44  ;;  %1283 = vmatpush3.msra.mxu0 %v126_v45  ;;  %v194_v42 = vld [vmem:[#allocation5 + $0x458] sm:$0xff]  ;;  %v209_v44 = vld [vmem:[#allocation5 + $0x4d0] sm:$0xff] }
  0x5c   :  { %1318 = vmatpush3.msra.mxu1 %v158_v46  ;;  %1284 = vmatprep.subr.mxu0 %v141_v48  ;;  %v226_v43 = vld [vmem:[#allocation5 + $0x558] sm:$0xff]  ;;  %v241_v45 = vld [vmem:[#allocation5 + $0x5d0] sm:$0xff] }
  0x5d   :  { %1319 = vmatprep.subr.mxu1 %v173_v49  ;;  %1285 = vmatpush3.msra.mxu0 %v125_v50  ;;  %v193_v46 = vld [vmem:[#allocation5 + $0x450] sm:$0xff]  ;;  %v208_v49 = vld [vmem:[#allocation5 + $0x4c8] sm:$0xff] }
  0x5e   :  { %1320 = vmatpush3.msra.mxu1 %v157_v51  ;;  %1286 = vmatprep.subr.mxu0 %v140_v52  ;;  %v225_v48 = vld [vmem:[#allocation5 + $0x550] sm:$0xff]  ;;  %v240_v50 = vld [vmem:[#allocation5 + $0x5c8] sm:$0xff] }
  0x5f   :  { %1321 = vmatprep.subr.mxu1 %v172_v53  ;;  %1287 = vmatpush3.msra.mxu0 %v124_v54  ;;  %v192_v51 = vld [vmem:[#allocation5 + $0x448] sm:$0xff]  ;;  %v207_v53 = vld [vmem:[#allocation5 + $0x4c0] sm:$0xff] }
  0x60   :  { %1322 = vmatpush3.msra.mxu1 %v156_v55  ;;  %1288 = vmatprep.subr.mxu0 %v139_v57  ;;  %v224_v52 = vld [vmem:[#allocation5 + $0x548] sm:$0xff]  ;;  %v239_v54 = vld [vmem:[#allocation5 + $0x5c0] sm:$0xff] }
  0x61   :  { %1323 = vmatprep.subr.mxu1 %v171_v58  ;;  %1289 = vmatpush3.msra.mxu0 %v123_v61  ;;  %v191_v55 = vld [vmem:[#allocation5 + $0x440] sm:$0xff]  ;;  %v206_v58 = vld [vmem:[#allocation5 + $0x4b8] sm:$0xff] }
  0x62   :  { %1324 = vmatpush3.msra.mxu1 %v155_v62  ;;  %1290 = vmatprep.subr.mxu0 %v138_v0  ;;  %v223_v57 = vld [vmem:[#allocation5 + $0x540] sm:$0xff]  ;;  %v238_v61 = vld [vmem:[#allocation5 + $0x5b8] sm:$0xff] }
  0x63   :  { %1325 = vmatprep.subr.mxu1 %v170_v1  ;;  %1291 = vmatpush3.msra.mxu0 %v122_v3  ;;  %v190_v62 = vld [vmem:[#allocation5 + $0x438] sm:$0xff]  ;;  %v205_v1 = vld [vmem:[#allocation5 + $0x4b0] sm:$0xff] }
  0x64   :  { %1326 = vmatpush3.msra.mxu1 %v154_v4  ;;  %1292 = vmatprep.subr.mxu0 %v137_v5  ;;  %v222_v0 = vld [vmem:[#allocation5 + $0x538] sm:$0xff]  ;;  %v237_v3 = vld [vmem:[#allocation5 + $0x5b0] sm:$0xff] }
  0x65   :  { %1327 = vmatprep.subr.mxu1 %v169_v6  ;;  %1293 = vmatpush3.msra.mxu0 %v121_v8  ;;  %v189_v4 = vld [vmem:[#allocation5 + $0x430] sm:$0xff]  ;;  %v204_v6 = vld [vmem:[#allocation5 + $0x4a8] sm:$0xff] }
  0x66   :  { %1328 = vmatpush3.msra.mxu1 %v153_v9  ;;  %1294 = vmatprep.subr.mxu0 %v136_v11  ;;  %v221_v5 = vld [vmem:[#allocation5 + $0x530] sm:$0xff]  ;;  %v236_v8 = vld [vmem:[#allocation5 + $0x5a8] sm:$0xff] }
  0x67   :  { %1329 = vmatprep.subr.mxu1 %v168_v12  ;;  %1295 = vmatpush3.msra.mxu0 %v120_v14  ;;  %v188_v9 = vld [vmem:[#allocation5 + $0x428] sm:$0xff]  ;;  %v203_v12 = vld [vmem:[#allocation5 + $0x4a0] sm:$0xff] }
  0x68   :  { %1330 = vmatpush3.msra.mxu1 %v152_v15  ;;  %1296 = vmatprep.subr.mxu0 %v135_v17  ;;  %v220_v11 = vld [vmem:[#allocation5 + $0x528] sm:$0xff]  ;;  %v235_v14 = vld [vmem:[#allocation5 + $0x5a0] sm:$0xff] }
  0x69   :  { %1331 = vmatprep.subr.mxu1 %v167_v18  ;;  %1297 = vmatpush3.msra.mxu0 %v119_v20  ;;  %v187_v15 = vld [vmem:[#allocation5 + $0x420] sm:$0xff]  ;;  %v202_v18 = vld [vmem:[#allocation5 + $0x498] sm:$0xff] }
  0x6a   :  { %683 = vmatprep.mubr.f32.mxu0 %v402_v19  ;;  %1332 = vmatpush3.msra.mxu1 %v151_v22  ;;  %v219_v17 = vld [vmem:[#allocation5 + $0x520] sm:$0xff]  ;;  %v234_v19 = vld [vmem:[#allocation5 + $0x598] sm:$0xff]  ;;  %v201_v22 = vld [vmem:[#allocation5 + $0x490] sm:$0xff] }
  0x6b   :  { %684 = vmatmul.mubr.f32.vlgmr.msra.gmra.mxu0 %v398_v21  ;;  %753 = vmatprep.mubr.f32.mxu1 %v410_v23  ;;  %v186_v20 = vld [vmem:[#allocation5 + $0x418] sm:$0xff]  ;;  %v233_v23 = vld [vmem:[#allocation5 + $0x590] sm:$0xff] }
  0x6c   :  { %1336 = vmatprep.subr.mxu0 %v214_v24  ;;  %1371 = vmatprep.subr.mxu1 %v246_v26  ;;  %v218_v21 = vld [vmem:[#allocation5 + $0x518] sm:$0xff]  ;;  %v185_v24 = vld [vmem:[#allocation5 + $0x410] sm:$0xff] }
  0x6d   :  { %754 = vmatmul.mubr.f32.vlgmr.msra.gmra.mxu1 %v406_v25  ;;  %1337 = vmatpush3.msra.mxu0 %v198_v27  ;;  %v217_v25 = vld [vmem:[#allocation5 + $0x510] sm:$0xff]  ;;  %v200_v27 = vld [vmem:[#allocation5 + $0x488] sm:$0xff] }
  0x6e   :  { %1372 = vmatpush3.msra.mxu1 %v230_v28  ;;  %1338 = vmatprep.subr.mxu0 %v213_v29  ;;  %v1713_v26 = vld [vmem:[#allocation2 + $0x8] sm:$0xff]  ;;  %v232_v28 = vld [vmem:[#allocation5 + $0x588] sm:$0xff] }
  0x6f   :  { %1373 = vmatprep.subr.mxu1 %v245_v30  ;;  %1339 = vmatpush3.msra.mxu0 %v197_v31  ;;  %v184_v29 = vld [vmem:[#allocation5 + $0x408] sm:$0xff]  ;;  %v199_v31 = vld [vmem:[#allocation5 + $0x480] sm:$0xff] }
  0x70   :  { %1374 = vmatpush3.msra.mxu1 %v229_v32  ;;  %1340 = vmatprep.subr.mxu0 %v212_v33  ;;  %v216_v30 = vld [vmem:[#allocation5 + $0x508] sm:$0xff]  ;;  %v231_v32 = vld [vmem:[#allocation5 + $0x580] sm:$0xff]  ;;  %v418_v33 = vrot.slane %v1713_v26, %v1676_v56 }
  0x71   :  { %1375 = vmatprep.subr.mxu1 %v244_v34  ;;  %1341 = vmatpush3.msra.mxu0 %v196_v59  ;;  %v183_v34 = vld [vmem:[#allocation5 + $0x400] sm:$0xff]  ;;  %v414_v59 = vrot.slane %v1713_v26, %v1681_v60 }
  0x72   :  { %1376 = vmatpush3.msra.mxu1 %v228_v35  ;;  %1342 = vmatprep.subr.mxu0 %v211_v36  ;;  %v215_v35 = vld [vmem:[#allocation5 + $0x500] sm:$0xff]  ;;  %v426_v36 = vrot.slane %v1713_v26, %v1684_v63 }
  0x73   :  { %1377 = vmatprep.subr.mxu1 %v243_v37  ;;  %1343 = vmatpush3.msra.mxu0 %v195_v38  ;;  %v278_v37 = vld [vmem:[#allocation5 + $0x6f8] sm:$0xff]  ;;  %v422_v38 = vrot.slane %v1713_v26, %v1687_v2 }
  0x74   :  { %1378 = vmatpush3.msra.mxu1 %v227_v39  ;;  %1344 = vmatprep.subr.mxu0 %v210_v40  ;;  %v310_v39 = vld [vmem:[#allocation5 + $0x7f8] sm:$0xff] }
  0x75   :  { %1379 = vmatprep.subr.mxu1 %v242_v41  ;;  %1345 = vmatpush3.msra.mxu0 %v194_v42  ;;  %v262_v40 = vld [vmem:[#allocation5 + $0x678] sm:$0xff]  ;;  %v277_v42 = vld [vmem:[#allocation5 + $0x6f0] sm:$0xff] }
  0x76   :  { %1380 = vmatpush3.msra.mxu1 %v226_v43  ;;  %1346 = vmatprep.subr.mxu0 %v209_v44  ;;  %v294_v41 = vld [vmem:[#allocation5 + $0x778] sm:$0xff]  ;;  %v309_v43 = vld [vmem:[#allocation5 + $0x7f0] sm:$0xff] }
  0x77   :  { %1381 = vmatprep.subr.mxu1 %v241_v45  ;;  %1347 = vmatpush3.msra.mxu0 %v193_v46  ;;  %v261_v44 = vld [vmem:[#allocation5 + $0x670] sm:$0xff]  ;;  %v276_v46 = vld [vmem:[#allocation5 + $0x6e8] sm:$0xff] }
  0x78   :  { %1382 = vmatpush3.msra.mxu1 %v225_v48  ;;  %1348 = vmatprep.subr.mxu0 %v208_v49  ;;  %v293_v45 = vld [vmem:[#allocation5 + $0x770] sm:$0xff]  ;;  %v308_v48 = vld [vmem:[#allocation5 + $0x7e8] sm:$0xff] }
  0x79   :  { %1383 = vmatprep.subr.mxu1 %v240_v50  ;;  %1349 = vmatpush3.msra.mxu0 %v192_v51  ;;  %v260_v49 = vld [vmem:[#allocation5 + $0x668] sm:$0xff]  ;;  %v275_v51 = vld [vmem:[#allocation5 + $0x6e0] sm:$0xff] }
  0x7a   :  { %1384 = vmatpush3.msra.mxu1 %v224_v52  ;;  %1350 = vmatprep.subr.mxu0 %v207_v53  ;;  %v292_v50 = vld [vmem:[#allocation5 + $0x768] sm:$0xff]  ;;  %v307_v52 = vld [vmem:[#allocation5 + $0x7e0] sm:$0xff] }
  0x7b   :  { %1385 = vmatprep.subr.mxu1 %v239_v54  ;;  %1351 = vmatpush3.msra.mxu0 %v191_v55  ;;  %v259_v53 = vld [vmem:[#allocation5 + $0x660] sm:$0xff]  ;;  %v274_v55 = vld [vmem:[#allocation5 + $0x6d8] sm:$0xff] }
  0x7c   :  { %1386 = vmatpush3.msra.mxu1 %v223_v57  ;;  %1352 = vmatprep.subr.mxu0 %v206_v58  ;;  %v291_v54 = vld [vmem:[#allocation5 + $0x760] sm:$0xff]  ;;  %v306_v57 = vld [vmem:[#allocation5 + $0x7d8] sm:$0xff] }
  0x7d   :  { %1387 = vmatprep.subr.mxu1 %v238_v61  ;;  %1353 = vmatpush3.msra.mxu0 %v190_v62  ;;  %v258_v58 = vld [vmem:[#allocation5 + $0x658] sm:$0xff]  ;;  %v273_v62 = vld [vmem:[#allocation5 + $0x6d0] sm:$0xff] }
  0x7e   :  { %1388 = vmatpush3.msra.mxu1 %v222_v0  ;;  %1354 = vmatprep.subr.mxu0 %v205_v1  ;;  %v290_v61 = vld [vmem:[#allocation5 + $0x758] sm:$0xff]  ;;  %v305_v0 = vld [vmem:[#allocation5 + $0x7d0] sm:$0xff] }
  0x7f   :  { %1389 = vmatprep.subr.mxu1 %v237_v3  ;;  %1355 = vmatpush3.msra.mxu0 %v189_v4  ;;  %v257_v1 = vld [vmem:[#allocation5 + $0x650] sm:$0xff]  ;;  %v272_v4 = vld [vmem:[#allocation5 + $0x6c8] sm:$0xff] }
  0x80   :  { %1390 = vmatpush3.msra.mxu1 %v221_v5  ;;  %1356 = vmatprep.subr.mxu0 %v204_v6  ;;  %v289_v3 = vld [vmem:[#allocation5 + $0x750] sm:$0xff]  ;;  %v304_v5 = vld [vmem:[#allocation5 + $0x7c8] sm:$0xff] }
  0x81   :  { %1391 = vmatprep.subr.mxu1 %v236_v8  ;;  %1357 = vmatpush3.msra.mxu0 %v188_v9  ;;  %v256_v6 = vld [vmem:[#allocation5 + $0x648] sm:$0xff]  ;;  %v271_v9 = vld [vmem:[#allocation5 + $0x6c0] sm:$0xff] }
  0x82   :  { %1392 = vmatpush3.msra.mxu1 %v220_v11  ;;  %1358 = vmatprep.subr.mxu0 %v203_v12  ;;  %v288_v8 = vld [vmem:[#allocation5 + $0x748] sm:$0xff]  ;;  %v303_v11 = vld [vmem:[#allocation5 + $0x7c0] sm:$0xff] }
  0x83   :  { %1393 = vmatprep.subr.mxu1 %v235_v14  ;;  %1359 = vmatpush3.msra.mxu0 %v187_v15  ;;  %v255_v12 = vld [vmem:[#allocation5 + $0x640] sm:$0xff]  ;;  %v270_v15 = vld [vmem:[#allocation5 + $0x6b8] sm:$0xff] }
  0x84   :  { %1394 = vmatpush3.msra.mxu1 %v219_v17  ;;  %1360 = vmatprep.subr.mxu0 %v202_v18  ;;  %v287_v14 = vld [vmem:[#allocation5 + $0x740] sm:$0xff]  ;;  %v302_v17 = vld [vmem:[#allocation5 + $0x7b8] sm:$0xff] }
  0x85   :  { %1395 = vmatprep.subr.mxu1 %v234_v19  ;;  %1361 = vmatpush3.msra.mxu0 %v186_v20  ;;  %v254_v18 = vld [vmem:[#allocation5 + $0x638] sm:$0xff]  ;;  %v269_v20 = vld [vmem:[#allocation5 + $0x6b0] sm:$0xff] }
  0x86   :  { %1396 = vmatpush3.msra.mxu1 %v218_v21  ;;  %1362 = vmatprep.subr.mxu0 %v201_v22  ;;  %v286_v19 = vld [vmem:[#allocation5 + $0x738] sm:$0xff]  ;;  %v301_v21 = vld [vmem:[#allocation5 + $0x7b0] sm:$0xff] }
  0x87   :  { %1397 = vmatprep.subr.mxu1 %v233_v23  ;;  %1363 = vmatpush3.msra.mxu0 %v185_v24  ;;  %v253_v22 = vld [vmem:[#allocation5 + $0x630] sm:$0xff]  ;;  %v268_v24 = vld [vmem:[#allocation5 + $0x6a8] sm:$0xff] }
  0x88   :  { %1398 = vmatpush3.msra.mxu1 %v217_v25  ;;  %1364 = vmatprep.subr.mxu0 %v200_v27  ;;  %v285_v23 = vld [vmem:[#allocation5 + $0x730] sm:$0xff]  ;;  %v300_v25 = vld [vmem:[#allocation5 + $0x7a8] sm:$0xff] }
  0x89   :  { %1399 = vmatprep.subr.mxu1 %v232_v28  ;;  %1365 = vmatpush3.msra.mxu0 %v184_v29  ;;  %v252_v27 = vld [vmem:[#allocation5 + $0x628] sm:$0xff]  ;;  %v267_v29 = vld [vmem:[#allocation5 + $0x6a0] sm:$0xff] }
  0x8a   :  { %1400 = vmatpush3.msra.mxu1 %v216_v30  ;;  %1366 = vmatprep.subr.mxu0 %v199_v31  ;;  %v284_v28 = vld [vmem:[#allocation5 + $0x728] sm:$0xff]  ;;  %v299_v30 = vld [vmem:[#allocation5 + $0x7a0] sm:$0xff] }
  0x8b   :  { %1401 = vmatprep.subr.mxu1 %v231_v32  ;;  %1367 = vmatpush3.msra.mxu0 %v183_v34  ;;  %v251_v31 = vld [vmem:[#allocation5 + $0x620] sm:$0xff]  ;;  %v298_v34 = vld [vmem:[#allocation5 + $0x798] sm:$0xff] }
  0x8c   :  { %823 = vmatprep.mubr.f32.mxu0 %v418_v33  ;;  %1402 = vmatpush3.msra.mxu1 %v215_v35  ;;  %v283_v32 = vld [vmem:[#allocation5 + $0x720] sm:$0xff]  ;;  %v266_v33 = vld [vmem:[#allocation5 + $0x698] sm:$0xff] }
  0x8d   :  { %824 = vmatmul.mubr.f32.vlgmr.msra.gmra.mxu0 %v414_v59  ;;  %893 = vmatprep.mubr.f32.mxu1 %v426_v36  ;;  %v250_v59 = vld [vmem:[#allocation5 + $0x618] sm:$0xff]  ;;  %v265_v36 = vld [vmem:[#allocation5 + $0x690] sm:$0xff] }
  0x8e   :  { %1406 = vmatprep.subr.mxu0 %v278_v37  ;;  %1441 = vmatprep.subr.mxu1 %v310_v39  ;;  %v282_v35 = vld [vmem:[#allocation5 + $0x718] sm:$0xff]  ;;  %v297_v37 = vld [vmem:[#allocation5 + $0x790] sm:$0xff] }
  0x8f   :  { %894 = vmatmul.mubr.f32.vlgmr.msra.gmra.mxu1 %v422_v38  ;;  %1407 = vmatpush3.msra.mxu0 %v262_v40  ;;  %v249_v38 = vld [vmem:[#allocation5 + $0x610] sm:$0xff]  ;;  %v264_v40 = vld [vmem:[#allocation5 + $0x688] sm:$0xff] }
  0x90   :  { %1442 = vmatpush3.msra.mxu1 %v294_v41  ;;  %1408 = vmatprep.subr.mxu0 %v277_v42  ;;  %v281_v39 = vld [vmem:[#allocation5 + $0x710] sm:$0xff]  ;;  %v296_v41 = vld [vmem:[#allocation5 + $0x788] sm:$0xff] }
  0x91   :  { %1443 = vmatprep.subr.mxu1 %v309_v43  ;;  %1409 = vmatpush3.msra.mxu0 %v261_v44  ;;  %v248_v42 = vld [vmem:[#allocation5 + $0x608] sm:$0xff]  ;;  %v263_v44 = vld [vmem:[#allocation5 + $0x680] sm:$0xff] }
  0x92   :  { %1444 = vmatpush3.msra.mxu1 %v293_v45  ;;  %1410 = vmatprep.subr.mxu0 %v276_v46  ;;  %v280_v43 = vld [vmem:[#allocation5 + $0x708] sm:$0xff]  ;;  %v295_v45 = vld [vmem:[#allocation5 + $0x780] sm:$0xff]  ;;  %v434_v46 = vrot.slane %v1713_v26, %v401_v7  ;;  %v438_v7 = vrot.slane %v1713_v26, %v405_v16 }
  0x93   :  { %1445 = vmatprep.subr.mxu1 %v308_v48  ;;  %1411 = vmatpush3.msra.mxu0 %v260_v49  ;;  %v247_v48 = vld [vmem:[#allocation5 + $0x600] sm:$0xff]  ;;  %v430_v49 = vrot.slane %v1713_v26, %v397_v10  ;;  %v326_v10 = vld [vmem:[#allocation5 + $0x878] sm:$0xff]  ;;  %v324_v16 = vld [vmem:[#allocation5 + $0x868] sm:$0xff] }
  0x94   :  { %1446 = vmatpush3.msra.mxu1 %v292_v50  ;;  %1412 = vmatprep.subr.mxu0 %v275_v51  ;;  %v279_v50 = vld [vmem:[#allocation5 + $0x700] sm:$0xff]  ;;  %v442_v51 = vrot.slane %v1713_v26, %v409_v13  ;;  %v325_v13 = vld [vmem:[#allocation5 + $0x870] sm:$0xff]  ;;  %v356_v26 = vld [vmem:[#allocation5 + $0x968] sm:$0xff] }
  0x95   :  { %1447 = vmatprep.subr.mxu1 %v307_v52  ;;  %1413 = vmatpush3.msra.mxu0 %v259_v53  ;;  %v342_v52 = vld [vmem:[#allocation5 + $0x8f8] sm:$0xff] }
  0x96   :  { %1448 = vmatpush3.msra.mxu1 %v291_v54  ;;  %1414 = vmatprep.subr.mxu0 %v274_v55  ;;  %v374_v53 = vld [vmem:[#allocation5 + $0x9f8] sm:$0xff]  ;;  %v341_v55 = vld [vmem:[#allocation5 + $0x8f0] sm:$0xff] }
  0x97   :  { %1449 = vmatprep.subr.mxu1 %v306_v57  ;;  %1415 = vmatpush3.msra.mxu0 %v258_v58  ;;  %v358_v54 = vld [vmem:[#allocation5 + $0x978] sm:$0xff]  ;;  %v373_v57 = vld [vmem:[#allocation5 + $0x9f0] sm:$0xff] }
  0x98   :  { %1450 = vmatpush3.msra.mxu1 %v290_v61  ;;  %1416 = vmatprep.subr.mxu0 %v273_v62  ;;  %v357_v58 = vld [vmem:[#allocation5 + $0x970] sm:$0xff]  ;;  %v372_v61 = vld [vmem:[#allocation5 + $0x9e8] sm:$0xff]  ;;  %v339_v62 = vld [vmem:[#allocation5 + $0x8e0] sm:$0xff] }
  0x99   :  { %1451 = vmatprep.subr.mxu1 %v305_v0  ;;  %1417 = vmatpush3.msra.mxu0 %v257_v1  ;;  %v371_v0 = vld [vmem:[#allocation5 + $0x9e0] sm:$0xff] }
  0x9a   :  { %1452 = vmatpush3.msra.mxu1 %v289_v3  ;;  %1418 = vmatprep.subr.mxu0 %v272_v4  ;;  %v323_v1 = vld [vmem:[#allocation5 + $0x860] sm:$0xff]  ;;  %v338_v4 = vld [vmem:[#allocation5 + $0x8d8] sm:$0xff] }
  0x9b   :  { %1453 = vmatprep.subr.mxu1 %v304_v5  ;;  %1419 = vmatpush3.msra.mxu0 %v256_v6  ;;  %v355_v3 = vld [vmem:[#allocation5 + $0x960] sm:$0xff]  ;;  %v370_v5 = vld [vmem:[#allocation5 + $0x9d8] sm:$0xff] }
  0x9c   :  { %1454 = vmatpush3.msra.mxu1 %v288_v8  ;;  %1420 = vmatprep.subr.mxu0 %v271_v9  ;;  %v322_v6 = vld [vmem:[#allocation5 + $0x858] sm:$0xff]  ;;  %v337_v9 = vld [vmem:[#allocation5 + $0x8d0] sm:$0xff] }
  0x9d   :  { %1455 = vmatprep.subr.mxu1 %v303_v11  ;;  %1421 = vmatpush3.msra.mxu0 %v255_v12  ;;  %v354_v8 = vld [vmem:[#allocation5 + $0x958] sm:$0xff]  ;;  %v369_v11 = vld [vmem:[#allocation5 + $0x9d0] sm:$0xff] }
  0x9e   :  { %1456 = vmatpush3.msra.mxu1 %v287_v14  ;;  %1422 = vmatprep.subr.mxu0 %v270_v15  ;;  %v321_v12 = vld [vmem:[#allocation5 + $0x850] sm:$0xff]  ;;  %v336_v15 = vld [vmem:[#allocation5 + $0x8c8] sm:$0xff] }
  0x9f   :  { %1457 = vmatprep.subr.mxu1 %v302_v17  ;;  %1423 = vmatpush3.msra.mxu0 %v254_v18  ;;  %v353_v14 = vld [vmem:[#allocation5 + $0x950] sm:$0xff]  ;;  %v368_v17 = vld [vmem:[#allocation5 + $0x9c8] sm:$0xff] }
  0xa0   :  { %1458 = vmatpush3.msra.mxu1 %v286_v19  ;;  %1424 = vmatprep.subr.mxu0 %v269_v20  ;;  %v320_v18 = vld [vmem:[#allocation5 + $0x848] sm:$0xff]  ;;  %v335_v20 = vld [vmem:[#allocation5 + $0x8c0] sm:$0xff] }
  0xa1   :  { %1459 = vmatprep.subr.mxu1 %v301_v21  ;;  %1425 = vmatpush3.msra.mxu0 %v253_v22  ;;  %v352_v19 = vld [vmem:[#allocation5 + $0x948] sm:$0xff]  ;;  %v367_v21 = vld [vmem:[#allocation5 + $0x9c0] sm:$0xff] }
  0xa2   :  { %1460 = vmatpush3.msra.mxu1 %v285_v23  ;;  %1426 = vmatprep.subr.mxu0 %v268_v24  ;;  %v319_v22 = vld [vmem:[#allocation5 + $0x840] sm:$0xff]  ;;  %v334_v24 = vld [vmem:[#allocation5 + $0x8b8] sm:$0xff] }
  0xa3   :  { %1461 = vmatprep.subr.mxu1 %v300_v25  ;;  %1427 = vmatpush3.msra.mxu0 %v252_v27  ;;  %v351_v23 = vld [vmem:[#allocation5 + $0x940] sm:$0xff]  ;;  %v366_v25 = vld [vmem:[#allocation5 + $0x9b8] sm:$0xff] }
  0xa4   :  { %1462 = vmatpush3.msra.mxu1 %v284_v28  ;;  %1428 = vmatprep.subr.mxu0 %v267_v29  ;;  %v318_v27 = vld [vmem:[#allocation5 + $0x838] sm:$0xff]  ;;  %v333_v29 = vld [vmem:[#allocation5 + $0x8b0] sm:$0xff] }
  0xa5   :  { %1463 = vmatprep.subr.mxu1 %v299_v30  ;;  %1429 = vmatpush3.msra.mxu0 %v251_v31  ;;  %v350_v28 = vld [vmem:[#allocation5 + $0x938] sm:$0xff]  ;;  %v365_v30 = vld [vmem:[#allocation5 + $0x9b0] sm:$0xff] }
  0xa6   :  { %1464 = vmatpush3.msra.mxu1 %v283_v32  ;;  %1430 = vmatprep.subr.mxu0 %v266_v33  ;;  %v317_v31 = vld [vmem:[#allocation5 + $0x830] sm:$0xff]  ;;  %v332_v33 = vld [vmem:[#allocation5 + $0x8a8] sm:$0xff] }
  0xa7   :  { %1465 = vmatprep.subr.mxu1 %v298_v34  ;;  %1431 = vmatpush3.msra.mxu0 %v250_v59  ;;  %v349_v32 = vld [vmem:[#allocation5 + $0x930] sm:$0xff]  ;;  %v364_v34 = vld [vmem:[#allocation5 + $0x9a8] sm:$0xff] }
  0xa8   :  { %1466 = vmatpush3.msra.mxu1 %v282_v35  ;;  %1432 = vmatprep.subr.mxu0 %v265_v36  ;;  %v316_v59 = vld [vmem:[#allocation5 + $0x828] sm:$0xff]  ;;  %v331_v36 = vld [vmem:[#allocation5 + $0x8a0] sm:$0xff] }
  0xa9   :  { %1467 = vmatprep.subr.mxu1 %v297_v37  ;;  %1433 = vmatpush3.msra.mxu0 %v249_v38  ;;  %v348_v35 = vld [vmem:[#allocation5 + $0x928] sm:$0xff]  ;;  %v363_v37 = vld [vmem:[#allocation5 + $0x9a0] sm:$0xff] }
  0xaa   :  { %1468 = vmatpush3.msra.mxu1 %v281_v39  ;;  %1434 = vmatprep.subr.mxu0 %v264_v40  ;;  %v315_v38 = vld [vmem:[#allocation5 + $0x820] sm:$0xff]  ;;  %v330_v40 = vld [vmem:[#allocation5 + $0x898] sm:$0xff] }
  0xab   :  { %1469 = vmatprep.subr.mxu1 %v296_v41  ;;  %1435 = vmatpush3.msra.mxu0 %v248_v42  ;;  %v347_v39 = vld [vmem:[#allocation5 + $0x920] sm:$0xff]  ;;  %v362_v41 = vld [vmem:[#allocation5 + $0x998] sm:$0xff] }
  0xac   :  { %1470 = vmatpush3.msra.mxu1 %v280_v43  ;;  %1436 = vmatprep.subr.mxu0 %v263_v44  ;;  %v314_v42 = vld [vmem:[#allocation5 + $0x818] sm:$0xff]  ;;  %v329_v44 = vld [vmem:[#allocation5 + $0x890] sm:$0xff] }
  0xad   :  { %1471 = vmatprep.subr.mxu1 %v295_v45  ;;  %1437 = vmatpush3.msra.mxu0 %v247_v48  ;;  %v346_v43 = vld [vmem:[#allocation5 + $0x918] sm:$0xff]  ;;  %v361_v45 = vld [vmem:[#allocation5 + $0x990] sm:$0xff] }
  0xae   :  { %963 = vmatprep.mubr.f32.mxu0 %v434_v46  ;;  %1472 = vmatpush3.msra.mxu1 %v279_v50  ;;  %v313_v46 = vld [vmem:[#allocation5 + $0x810] sm:$0xff]  ;;  %v328_v50 = vld [vmem:[#allocation5 + $0x888] sm:$0xff] }
  0xaf   :  { %964 = vmatmul.mubr.f32.vlgmr.msra.gmra.mxu0 %v430_v49  ;;  %1033 = vmatprep.mubr.f32.mxu1 %v442_v51  ;;  %v345_v48 = vld [vmem:[#allocation5 + $0x910] sm:$0xff]  ;;  %v54_v49 = vld [vmem:[#allocation2 + $0x10] sm:$0xf]  ;;  %v360_v51 = vld [vmem:[#allocation5 + $0x988] sm:$0xff] }
  0xb0   :  { %1476 = vmatprep.subr.mxu0 %v342_v52  ;;  %1511 = vmatprep.subr.mxu1 %v374_v53  ;;  %v312_v52 = vld [vmem:[#allocation5 + $0x808] sm:$0xff]  ;;  %v327_v53 = vld [vmem:[#allocation5 + $0x880] sm:$0xff] }
  0xb1   :  { %1034 = vmatmul.mubr.f32.vlgmr.msra.gmra.mxu1 %v438_v7  ;;  %1477 = vmatpush3.msra.mxu0 %v326_v10  ;;  %v344_v7 = vld [vmem:[#allocation5 + $0x908] sm:$0xff]  ;;  %v359_v10 = vld [vmem:[#allocation5 + $0x980] sm:$0xff] }
  0xb2   :  { %1512 = vmatpush3.msra.mxu1 %v358_v54  ;;  %1478 = vmatprep.subr.mxu0 %v341_v55  ;;  %v450_v54 = vrot.slane %v54_v49, %v1676_v56  ;;  %v311_v55 = vld [vmem:[#allocation5 + $0x800] sm:$0xff] }
  0xb3   :  { %1513 = vmatprep.subr.mxu1 %v373_v57  ;;  %1479 = vmatpush3.msra.mxu0 %v325_v13  ;;  %v458_v57 = vrot.slane %v54_v49, %v1684_v63  ;;  %v343_v13 = vld [vmem:[#allocation5 + $0x900] sm:$0xff] }
  0xb4   :  { %1514 = vmatpush3.msra.mxu1 %v357_v58  ;;  %1480 = vmatprep.subr.mxu0 %v340_v47  ;;  %v446_v58 = vrot.slane %v54_v49, %v1681_v60  ;;  %v454_v47 = vrot.slane %v54_v49, %v1687_v2 }
  0xb5   :  { %1515 = vmatprep.subr.mxu1 %v372_v61  ;;  %1481 = vmatpush3.msra.mxu0 %v324_v16 }
  0xb6   :  { %1516 = vmatpush3.msra.mxu1 %v356_v26  ;;  %1482 = vmatprep.subr.mxu0 %v339_v62  ;;  %v375_v62 = vld [vmem:[#allocation7] sm:$0x1] }
  0xb7   :  { %1517 = vmatprep.subr.mxu1 %v371_v0  ;;  %1483 = vmatpush3.msra.mxu0 %v323_v1 }
  0xb8   :  { %1518 = vmatpush3.msra.mxu1 %v355_v3  ;;  %1484 = vmatprep.subr.mxu0 %v338_v4 }
  0xb9   :  { %1519 = vmatprep.subr.mxu1 %v370_v5  ;;  %1485 = vmatpush3.msra.mxu0 %v322_v6 }
  0xba   :  { %1520 = vmatpush3.msra.mxu1 %v354_v8  ;;  %1486 = vmatprep.subr.mxu0 %v337_v9 }
  0xbb   :  { %1521 = vmatprep.subr.mxu1 %v369_v11  ;;  %1487 = vmatpush3.msra.mxu0 %v321_v12 }
  0xbc   :  { %1522 = vmatpush3.msra.mxu1 %v353_v14  ;;  %1488 = vmatprep.subr.mxu0 %v336_v15 }
  0xbd   :  { %1523 = vmatprep.subr.mxu1 %v368_v17  ;;  %1489 = vmatpush3.msra.mxu0 %v320_v18 }
  0xbe   :  { %1524 = vmatpush3.msra.mxu1 %v352_v19  ;;  %1490 = vmatprep.subr.mxu0 %v335_v20 }
  0xbf   :  { %1525 = vmatprep.subr.mxu1 %v367_v21  ;;  %1491 = vmatpush3.msra.mxu0 %v319_v22 }
  0xc0   :  { %1526 = vmatpush3.msra.mxu1 %v351_v23  ;;  %1492 = vmatprep.subr.mxu0 %v334_v24 }
  0xc1   :  { %1527 = vmatprep.subr.mxu1 %v366_v25  ;;  %1493 = vmatpush3.msra.mxu0 %v318_v27 }
  0xc2   :  { %1528 = vmatpush3.msra.mxu1 %v350_v28  ;;  %1494 = vmatprep.subr.mxu0 %v333_v29 }
  0xc3   :  { %1529 = vmatprep.subr.mxu1 %v365_v30  ;;  %1495 = vmatpush3.msra.mxu0 %v317_v31 }
  0xc4   :  { %1530 = vmatpush3.msra.mxu1 %v349_v32  ;;  %1496 = vmatprep.subr.mxu0 %v332_v33 }
  0xc5   :  { %1531 = vmatprep.subr.mxu1 %v364_v34  ;;  %1497 = vmatpush3.msra.mxu0 %v316_v59 }
  0xc6   :  { %1532 = vmatpush3.msra.mxu1 %v348_v35  ;;  %1498 = vmatprep.subr.mxu0 %v331_v36 }
  0xc7   :  { %1533 = vmatprep.subr.mxu1 %v363_v37  ;;  %1499 = vmatpush3.msra.mxu0 %v315_v38 }
  0xc8   :  { %1534 = vmatpush3.msra.mxu1 %v347_v39  ;;  %1500 = vmatprep.subr.mxu0 %v330_v40 }
  0xc9   :  { %1535 = vmatprep.subr.mxu1 %v362_v41  ;;  %1501 = vmatpush3.msra.mxu0 %v314_v42 }
  0xca   :  { %1536 = vmatpush3.msra.mxu1 %v346_v43  ;;  %1502 = vmatprep.subr.mxu0 %v329_v44 }
  0xcb   :  { %1537 = vmatprep.subr.mxu1 %v361_v45  ;;  %1503 = vmatpush3.msra.mxu0 %v313_v46 }
  0xcc   :  { %1538 = vmatpush3.msra.mxu1 %v345_v48  ;;  %1504 = vmatprep.subr.mxu0 %v328_v50 }
  0xcd   :  { %1539 = vmatprep.subr.mxu1 %v360_v51  ;;  %1505 = vmatpush3.msra.mxu0 %v312_v52 }
  0xce   :  { %1540 = vmatpush3.msra.mxu1 %v344_v7  ;;  %1506 = vmatprep.subr.mxu0 %v327_v53 }
  0xcf   :  { %1541 = vmatprep.subr.mxu1 %v359_v10  ;;  %1507 = vmatpush3.msra.mxu0 %v311_v55 }
  0xd0   :  { %1103 = vmatprep.mubr.f32.mxu0 %v450_v54  ;;  %1542 = vmatpush3.msra.mxu1 %v343_v13 }
  0xd1   :  { %1173 = vmatprep.mubr.f32.mxu1 %v458_v57  ;;  %1104 = vmatmul.mubr.f32.vlgmr.msra.gmra.mxu0 %v446_v58 }
  0xd2   :  { %1174 = vmatmul.mubr.f32.vlgmr.msra.gmra.mxu1 %v454_v47 }
 0x109   :  { %v1228_v56 = vpop.f32.mrf.mxu0 }
 0x10b   :  { %v1263_v61 = vpop.f32.mrf.mxu1  ;;  %v1229_v16 = vpop.f32.mrf.mxu0 }
 0x10c   :  { %v1230_v63 = vadd.f32 %v1229_v16, %v1228_v56 }
 0x10d   :  { %v1264_v0 = vpop.f32.mrf.mxu1 }
 0x10e   :  { %v546_v60 = vadd.f32 %v1230_v63, %v375_v62  ;;  %v1265_v4 = vadd.f32 %v1264_v0, %v1263_v61 }
 0x110   :  { %v616_v8 = vadd.f32 %v1265_v4, %v546_v60 }
 0x12b   :  { %v1298_v26 = vpop.f32.mrf.mxu0 }
 0x12d   :  { %v1333_v1 = vpop.f32.mrf.mxu1  ;;  %v1299_v3 = vpop.f32.mrf.mxu0 }
 0x12e   :  { %v1300_v5 = vadd.f32 %v1299_v3, %v1298_v26 }
 0x12f   :  { %v1334_v6 = vpop.f32.mrf.mxu1 }
 0x130   :  { %v686_v12 = vadd.f32 %v1300_v5, %v616_v8  ;;  %v1335_v14 = vadd.f32 %v1334_v6, %v1333_v1 }
 0x132   :  { %v756_v19 = vadd.f32 %v1335_v14, %v686_v12 }
 0x14d   :  { %v1368_v2 = vpop.f32.mrf.mxu0 }
 0x14f   :  { %v1403_v9 = vpop.f32.mrf.mxu1  ;;  %v1369_v11 = vpop.f32.mrf.mxu0 }
 0x150   :  { %v1370_v17 = vadd.f32 %v1369_v11, %v1368_v2 }
 0x151   :  { %v1404_v18 = vpop.f32.mrf.mxu1 }
 0x152   :  { %v826_v22 = vadd.f32 %v1370_v17, %v756_v19  ;;  %v1405_v23 = vadd.f32 %v1404_v18, %v1403_v9 }
 0x154   :  { %v896_v27 = vadd.f32 %v1405_v23, %v826_v22 }
 0x16f   :  { %v1438_v15 = vpop.f32.mrf.mxu0 }
 0x171   :  { %v1473_v20 = vpop.f32.mrf.mxu1  ;;  %v1439_v21 = vpop.f32.mrf.mxu0 }
 0x172   :  { %v1440_v24 = vadd.f32 %v1439_v21, %v1438_v15 }
 0x173   :  { %v1474_v25 = vpop.f32.mrf.mxu1 }
 0x174   :  { %v966_v28 = vadd.f32 %v1440_v24, %v896_v27  ;;  %v1475_v29 = vadd.f32 %v1474_v25, %v1473_v20 }
 0x176   :  { %v1036_v34 = vadd.f32 %v1475_v29, %v966_v28 }
 0x191   :  { %v1508_v30 = vpop.f32.mrf.mxu0 }
 0x192   :  { %v1543_v31 = vpop.f32.mrf.mxu1 }
 0x193   :  { %v1509_v32 = vpop.f32.mrf.mxu0 }
 0x194   :  { %v1544_v33 = vpop.f32.mrf.mxu1  ;;  %v1510_v59 = vadd.f32 %v1509_v32, %v1508_v30 }
 0x195   :  { %v1545_v36 = vadd.f32 %v1544_v33, %v1543_v31 }
 0x196   :  { %v1106_v35 = vadd.f32 %v1510_v59, %v1036_v34 }
 0x198   :  { %v1176_v37 = vadd.f32 %v1545_v36, %v1106_v35 }
 0x19a   :  { %1179 = vst [vmem:[#allocation8] sm:$0x1] %v1176_v37 }
 0x19b   :  { %1623 = shalt.err (!%p1620_p5)
}
 0x19c   :  { %1189 = dma.vmem_to_hbm [thread:$0]  %s1187_s2, 16, %s1745_s3, [#allocation4]  }
 0x19d   :  { %1636 = dma.done.wait [#allocation4], 16  }
 0x19e   :  { %1637 = vsyncadd [#allocation4], 4294967280 }
 0x19f   :  { %1193 = vsyncpa [#allocation3], 1 }
 0x1a0   :  { %1194 = vsyncpa [#allocation6], 1 }
 0x1a1   :  { %1195 = vsyncpa [#allocation4], 1 }

</bundles_post_ra>
